<compile_context>
chip_gen: v7x
topology: tpu7x:2x2x1
jax: 0.10.0
libtpu: 0.0.40
codegen_flags: <defaults>
</compile_context>

<pallas_src>
import jax
import jax.numpy as jnp
from jax.experimental import pallas as pl
from jax.experimental.pallas import tpu as pltpu

INPUT_SIZE = 64
HIDDEN_SIZE = 10
LANE = 128                 # TPU lane width; the tiny hidden dim is zero-padded to this
DEFAULT_BATCH_TILE = 4096  # rows per grid step (review item 5: 4-8K amortizes overhead)
MIN_GRID_STEPS = 4         # give v7x's two TensorCores something to shard (item 8)


def _round_up(n, m):
    return ((n + m - 1) // m) * m


def chemnet_kernel(x_ref, w1_ref, b1_ref, w2_ref, b2_ref, o_ref):
    # x:  (TB, 64)   original input dtype; cast in-kernel (no wrapper astype pass)
    # w1: (64, 128)  param dtype (bf16 by default), hidden zero-padded 10 -> 128
    # b1: (1, 128)   f32
    # w2: (1, 128)   f32, fc2 weight as a zero-padded row
    # b2: (1, 1)     f32
    # o:  (1, TB)    f32 -- lane-dense row of per-example outputs
    x = x_ref[...].astype(w1_ref.dtype)
    # fc1 on the MXU (single bf16 pass with the default params), f32 accumulation.
    h = jnp.dot(x, w1_ref[...], preferred_element_type=jnp.float32)     # (TB, 128)
    h = jnp.maximum(h + b1_ref[...], 0.0)                               # bias + ReLU (VPU)
    # fc2: contract the hidden (minor) dims of (1,128) x (TB,128) -> (1, TB).  The batch
    # index lands on lanes, so the store below is lane-dense and there is no per-row
    # XLU lane reduction.  Zero-padded hidden columns contribute exactly zero.
    y = jnp.einsum('oj,nj->on', w2_ref[...], h,
                   preferred_element_type=jnp.float32) + b2_ref[...]    # (1, TB)
    o_ref[...] = y.astype(o_ref.dtype)


def prepare_params(w1, b1, w2, b2, param_dtype=jnp.bfloat16):
    """Pad / lay out parameters ONCE, outside the per-call hot path.

    w1: (INPUT_SIZE, HIDDEN) stored as (in_features, out_features) [PyTorch fc1.weight.T]
    b1: (HIDDEN,)   w2: (HIDDEN, 1) [PyTorch fc2.weight.T]   b2: (1,)
    param_dtype=bfloat16 stores the fc1 weight in bf16 (single MXU pass); pass float32
    for bit-exact f32 results.
    """
    w1p = jnp.zeros((INPUT_SIZE, LANE), param_dtype).at[:, :HIDDEN_SIZE].set(
        w1.astype(param_dtype))
    b1p = jnp.zeros((1, LANE), jnp.float32).at[0, :HIDDEN_SIZE].set(
        b1.astype(jnp.float32))
    w2p = jnp.zeros((1, LANE), jnp.float32).at[0, :HIDDEN_SIZE].set(
        w2[:, 0].astype(jnp.float32))
    b2p = jnp.reshape(b2.astype(jnp.float32), (1, 1))
    return w1p, b1p, w2p, b2p


def _choose_batch_tile(batch, batch_tile):
    """128-aligned batch tile: <= batch_tile rows, balanced across >= MIN_GRID_STEPS
    tiles when the batch allows it, and derived from cdiv(B, n) so an unlucky batch size
    (e.g. 1025) does not pad up a whole extra tile (review item 7)."""
    batch_tile = max(LANE, _round_up(batch_tile, LANE))
    n_tiles = max(pl.cdiv(batch, batch_tile),
                  min(MIN_GRID_STEPS, pl.cdiv(batch, LANE)))
    return _round_up(pl.cdiv(batch, n_tiles), LANE)


def chemnet_forward(x, params, batch_tile=DEFAULT_BATCH_TILE):
    """x: (B, INPUT_SIZE). params: output of prepare_params(). Returns (B, 1) f32."""
    w1p, b1p, w2p, b2p = params
    B = x.shape[0]
    assert x.shape[1] == INPUT_SIZE

    tb = _choose_batch_tile(B, batch_tile)

    x_in = x
    if B < tb:
        # Tiny batches only (< one 128-aligned tile): pad to a single full block.
        # This is the only remaining wrapper-side pad and touches < 32 KiB.
        x_in = jnp.pad(x, ((0, tb - B), (0, 0)))
    grid_n = pl.cdiv(x_in.shape[0], tb)   # ragged B: Pallas handles the partial last block
    b_pad = grid_n * tb

    x_bytes = B * INPUT_SIZE * jnp.dtype(x.dtype).itemsize
    param_bytes = INPUT_SIZE * LANE * jnp.dtype(w1p.dtype).itemsize + 3 * LANE * 4
    cost = pl.CostEstimate(
        flops=2 * B * INPUT_SIZE * HIDDEN_SIZE + 2 * B * HIDDEN_SIZE,
        transcendentals=0,
        bytes_accessed=int(x_bytes + b_pad * 4 + param_bytes),
    )

    out = pl.pallas_call(
        chemnet_kernel,
        out_shape=jax.ShapeDtypeStruct((1, b_pad), jnp.float32),
        grid=(grid_n,),
        in_specs=[
            pl.BlockSpec((tb, INPUT_SIZE), lambda i: (i, 0)),
            pl.BlockSpec((INPUT_SIZE, LANE), lambda i: (0, 0)),
            pl.BlockSpec((1, LANE), lambda i: (0, 0)),
            pl.BlockSpec((1, LANE), lambda i: (0, 0)),
            pl.BlockSpec((1, 1), lambda i: (0, 0)),
        ],
        out_specs=pl.BlockSpec((1, tb), lambda i: (0, i)),
        compiler_params=pltpu.CompilerParams(
            # Independent batch tiles -> megacore sharding on v7x; neutral elsewhere.
            dimension_semantics=("parallel",),
        ),
        cost_estimate=cost,
    )(x_in, w1p, b1p, w2p, b2p)

    # (1, b_pad) -> (b_pad, 1) is a free bitcast-reshape; the row slice is B*4 bytes.
    return out[0, :B].reshape(B, 1)


def init_params(key):
    """Deterministic init mirroring nn.Linear default: U(-1/sqrt(fan_in), 1/sqrt(fan_in))."""
    k1, k2, k3, k4 = jax.random.split(key, 4)
    bound1 = 1.0 / jnp.sqrt(float(INPUT_SIZE))
    bound2 = 1.0 / jnp.sqrt(float(HIDDEN_SIZE))
    # Stored as (in_features, out_features), i.e. the transpose of PyTorch's weight.
    w1 = jax.random.uniform(k1, (INPUT_SIZE, HIDDEN_SIZE), jnp.float32, -bound1, bound1)
    b1 = jax.random.uniform(k2, (HIDDEN_SIZE,), jnp.float32, -bound1, bound1)
    w2 = jax.random.uniform(k3, (HIDDEN_SIZE, 1), jnp.float32, -bound2, bound2)
    b2 = jax.random.uniform(k4, (1,), jnp.float32, -bound2, bound2)
    return w1, b1, w2, b2


if __name__ == "__main__":
    key = jax.random.PRNGKey(0)
    k_x1, k_x2, k_p = jax.random.split(key, 3)

    w1, b1, w2, b2 = init_params(k_p)

    def reference(x, w1_eff, cast_input):
        xe = x.astype(jnp.bfloat16).astype(jnp.float32) if cast_input else x
        h = jnp.maximum(
            jnp.dot(xe, w1_eff, precision=jax.lax.Precision.HIGHEST) + b1, 0.0)
        return jnp.dot(h, w2, precision=jax.lax.Precision.HIGHEST) + b2

    # --- default path: bf16 fc1 weight (matched reference uses the rounded weight) ----
    params = prepare_params(w1, b1, w2, b2)                   # pad + bf16 once, off hot path
    w1_bf = params[0].astype(jnp.float32)[:, :HIDDEN_SIZE]    # exactly what the kernel uses

    # Tiny single-tile batch (exercises the small-batch pad path).
    x_small = jax.random.normal(k_x1, (8, INPUT_SIZE), jnp.float32)
    out_small = jax.block_until_ready(chemnet_forward(x_small, params))
    assert out_small.shape == (8, 1)
    assert jnp.allclose(out_small, reference(x_small, w1_bf, True), atol=1e-3, rtol=1e-3)

    # Ragged batch: 3 pipelined grid steps with a partial final block (no wrapper pad).
    x_big = jax.random.normal(k_x2, (300, INPUT_SIZE), jnp.float32)
    out_big = jax.block_until_ready(chemnet_forward(x_big, params))
    assert out_big.shape == (300, 1)
    assert jnp.allclose(out_big, reference(x_big, w1_bf, True), atol=1e-3, rtol=1e-3)

    # --- f32 parameter path (param_dtype=float32) checked against the f32 reference ---
    params_f32 = prepare_params(w1, b1, w2, b2, param_dtype=jnp.float32)
    out_f32 = jax.block_until_ready(chemnet_forward(x_big, params_f32))
    assert out_f32.shape == (300, 1)
    assert jnp.allclose(out_f32, reference(x_big, w1, False), atol=1e-3, rtol=1e-3)

    print("KERNEL_OK")
</pallas_src>

<mosaic_0001>
module attributes {stable_mosaic.version = 11 : i64} {
  func.func @chemnet_kernel(%arg0: i32, %arg1: memref<128x64xf32, #tpu.memory_space<vmem>>, %arg2: memref<64x128xbf16, #tpu.memory_space<vmem>>, %arg3: memref<1x128xf32, #tpu.memory_space<vmem>>, %arg4: memref<1x128xf32, #tpu.memory_space<vmem>>, %arg5: memref<1x1xf32, #tpu.memory_space<vmem>>, %arg6: memref<1x128xf32, #tpu.memory_space<vmem>>) attributes {dimension_semantics = [#tpu.dimension_semantics<parallel>], iteration_bounds = array<i64: 1>, scalar_prefetch = 0 : i64, scratch_operands = 0 : i64, tpu.core_type = #tpu.core_type<tc>, window_params = [{transform_indices = @transform_0, window_bounds = array<i64: 128, 64>}, {pipeline_mode = #tpu.pipeline_mode<synchronous>, transform_indices = @transform_1, window_bounds = array<i64: 64, 128>}, {pipeline_mode = #tpu.pipeline_mode<synchronous>, transform_indices = @transform_2, window_bounds = array<i64: 1, 128>}, {pipeline_mode = #tpu.pipeline_mode<synchronous>, transform_indices = @transform_3, window_bounds = array<i64: 1, 128>}, {pipeline_mode = #tpu.pipeline_mode<synchronous>, transform_indices = @transform_4, window_bounds = array<i64: 1, 1>}, {transform_indices = @transform_5, window_bounds = array<i64: 1, 128>}]} {
    %c0 = arith.constant 0 : index
    %c0_0 = arith.constant 0 : index
    %0 = vector.load %arg1[%c0, %c0_0] : memref<128x64xf32, #tpu.memory_space<vmem>>, vector<128x64xf32>
    %1 = arith.truncf %0 : vector<128x64xf32> to vector<128x64xbf16>
    %c0_1 = arith.constant 0 : index
    %c0_2 = arith.constant 0 : index
    %2 = vector.load %arg2[%c0_1, %c0_2] : memref<64x128xbf16, #tpu.memory_space<vmem>>, vector<64x128xbf16>
    %cst = arith.constant dense<0.000000e+00> : vector<128x128xf32>
    %3 = tpu.matmul %1, %2, %cst {dimension_numbers = #tpu.dot_dimension_numbers<[1], [0], [0], [1], [0, 0, 1, 1], [], []>} : vector<128x64xbf16>, vector<64x128xbf16>, vector<128x128xf32> -> vector<128x128xf32>
    %c0_3 = arith.constant 0 : index
    %c0_4 = arith.constant 0 : index
    %4 = vector.load %arg3[%c0_3, %c0_4] : memref<1x128xf32, #tpu.memory_space<vmem>>, vector<1x128xf32>
    %5 = vector.broadcast %4 : vector<1x128xf32> to vector<128x128xf32>
    %6 = arith.addf %3, %5 : vector<128x128xf32>
    %cst_5 = arith.constant 0.000000e+00 : f32
    %7 = vector.broadcast %cst_5 : f32 to vector<128x128xf32>
    %8 = arith.maximumf %6, %7 : vector<128x128xf32>
    %c0_6 = arith.constant 0 : index
    %c0_7 = arith.constant 0 : index
    %9 = vector.load %arg4[%c0_6, %c0_7] : memref<1x128xf32, #tpu.memory_space<vmem>>, vector<1x128xf32>
    "tpu.trace_start"() <{level = 10 : i32, message = "oj,nj->on"}> : () -> ()
    %cst_8 = arith.constant dense<0.000000e+00> : vector<1x128xf32>
    %10 = tpu.matmul %9, %8, %cst_8 {dimension_numbers = #tpu.dot_dimension_numbers<[1], [1], [0], [0], [0, 0, 1, 0], [], []>} : vector<1x128xf32>, vector<128x128xf32>, vector<1x128xf32> -> vector<1x128xf32>
    "tpu.trace_stop"() : () -> ()
    %c0_9 = arith.constant 0 : index
    %c0_10 = arith.constant 0 : index
    %11 = vector.load %arg5[%c0_9, %c0_10] : memref<1x1xf32, #tpu.memory_space<vmem>>, vector<1x1xf32>
    %12 = vector.broadcast %11 : vector<1x1xf32> to vector<1x128xf32>
    %13 = arith.addf %10, %12 : vector<1x128xf32>
    %c0_11 = arith.constant 0 : index
    %c0_12 = arith.constant 0 : index
    %14 = vector.load %arg6[%c0_11, %c0_12] : memref<1x128xf32, #tpu.memory_space<vmem>>, vector<1x128xf32>
    tpu.vector_store %arg6[%c0_11, %c0_12], %13 {strides = array<i32>} : memref<1x128xf32, #tpu.memory_space<vmem>>, vector<1x128xf32>,
    return
  }
  func.func @transform_0(%arg0: i32) -> (i32, i32) {
    %c0_i32 = arith.constant 0 : i32
    %c0_i32_0 = arith.constant 0 : i32
    return %arg0, %c0_i32 : i32, i32
  }
  func.func @transform_1(%arg0: i32) -> (i32, i32) {
    %c0_i32 = arith.constant 0 : i32
    %c0_i32_0 = arith.constant 0 : i32
    %c0_i32_1 = arith.constant 0 : i32
    return %c0_i32, %c0_i32_0 : i32, i32
  }
  func.func @transform_2(%arg0: i32) -> (i32, i32) {
    %c0_i32 = arith.constant 0 : i32
    %c0_i32_0 = arith.constant 0 : i32
    %c0_i32_1 = arith.constant 0 : i32
    return %c0_i32, %c0_i32_0 : i32, i32
  }
  func.func @transform_3(%arg0: i32) -> (i32, i32) {
    %c0_i32 = arith.constant 0 : i32
    %c0_i32_0 = arith.constant 0 : i32
    %c0_i32_1 = arith.constant 0 : i32
    return %c0_i32, %c0_i32_0 : i32, i32
  }
  func.func @transform_4(%arg0: i32) -> (i32, i32) {
    %c0_i32 = arith.constant 0 : i32
    %c0_i32_0 = arith.constant 0 : i32
    %c0_i32_1 = arith.constant 0 : i32
    return %c0_i32, %c0_i32_0 : i32, i32
  }
  func.func @transform_5(%arg0: i32) -> (i32, i32) {
    %c0_i32 = arith.constant 0 : i32
    %c0_i32_0 = arith.constant 0 : i32
    return %c0_i32, %arg0 : i32, i32
  }
}

</mosaic_0001>

<bundles_post_ra>
// kernel: tpu_custom_call.1
= control target key start
LH: loop header
LB: loop body
LE: loop exit
PB: predicated region body
PF: predicated region fallthrough
CT: control target
= control target key end

     0   :  { %s612_s0 = inlined_call_operand.vmem [shape: f32[128,64], index: 0, kind: input, shape index: {}]   ;;  %s613_s1 = inlined_call_operand.vmem [shape: bf16[64,128], index: 1, kind: input, shape index: {}]   ;;  %s614_s2 = inlined_call_operand.vmem [shape: f32[1,128], index: 2, kind: input, shape index: {}]   ;;  %s615_s3 = inlined_call_operand.vmem [shape: f32[1,128], index: 3, kind: input, shape index: {}]   ;;  %s616_s4 = inlined_call_operand.<no memory space> [shape: f32[1,1], index: 4, kind: input, shape index: {}]   ;;  %s617_s5 = inlined_call_operand.hbm [shape: f32[1,128], index: 5, kind: output, shape index: {}]  }
   0x1   :  { %v10_v0 = vstv %s616_s4 }
   0x2   :  { %11 = vst [vmem:[#allocation2] sm:$0x1] %v10_v0 }
   0x3   :  { %v452_v1 = vld [vmem:[%s613_s1] sm:$0xff]   ;;  %v453_v2 = vld [vmem:[%s613_s1 + $0x8] sm:$0xff]   ;;  %v454_v3 = vld [vmem:[%s613_s1 + $0x10] sm:$0xff]   ;;  %vm87_vm0 = vcmask 523264  }
   0x4   :  { %363 = vmatprep.subr.bf16.mxu0 %v452_v1  ;;  %v24_v4 = vld [vmem:[%s612_s0] sm:$0xff]  ;;  %v25_v5 = vld [vmem:[%s612_s0 + $0x8] sm:$0xff]  ;;  %v455_v7 = vld [vmem:[%s613_s1 + $0x18] sm:$0xff]  }
   0x5   :  { %364 = vmatpush3.bf16.msra.mxu0 %v452_v1  ;;  %v40_v6 = vpack.c.bf16 %v25_v5, %v24_v4 }
   0x6   :  { %365 = vmatprep.subr.bf16.mxu0 %v453_v2 }
   0x7   :  { %371 = vmatprep.mubr.msk.bf16.mxu0 %vm87_vm0, %v40_v6 }
   0x9   :  { %366 = vmatpush3.bf16.msra.mxu0 %v453_v2 }
   0xa   :  { %367 = vmatprep.subr.bf16.mxu0 %v454_v3 }
   0xb   :  { %12 = vsyncpa [#allocation4], 0  ;;  %v26_v8 = vld [vmem:[%s612_s0 + $0x10] sm:$0xff]  ;;  %v27_v9 = vld [vmem:[%s612_s0 + $0x18] sm:$0xff]  ;;  %v480_v29 = vmov 0.0|0.0   ;;  %vm481_vm1 = vmmov 0  }
   0xc   :  { %v28_v10 = vld [vmem:[%s612_s0 + $0x20] sm:$0xff]  ;;  %v29_v11 = vld [vmem:[%s612_s0 + $0x28] sm:$0xff]  ;;  %v41_v12 = vpack.c.bf16 %v27_v9, %v26_v8  ;;  %v30_v14 = vld [vmem:[%s612_s0 + $0x30] sm:$0xff]  ;;  %422 = vmatprep.subr.bf16.mxu1 %v480_v29  ;;  %v482_v30 = vmov 0.0   ;;  %v483_v32 = vmov 0   ;;  %s484_s9 = smov [#allocation3]  }
   0xd   :  { %368 = vmatpush3.bf16.msra.mxu0 %v454_v3  ;;  %v42_v13 = vpack.c.bf16 %v29_v11, %v28_v10  ;;  %v31_v15 = vld [vmem:[%s612_s0 + $0x38] sm:$0xff]  ;;  %v32_v16 = vld [vmem:[%s612_s0 + $0x40] sm:$0xff]  ;;  %v33_v17 = vld [vmem:[%s612_s0 + $0x48] sm:$0xff]  ;;  %419 = vmatprep.mubr.msk.f32.mxu1 %vm481_vm1, %v482_v30  ;;  %s313_s10 = sshll.u32 %s484_s9, 4  ;;  %s314_s10 = int_to_ptr.vmem [resolvable:$true] %s313_s10 }
   0xe   :  { %369 = vmatprep.subr.bf16.mxu0 %v455_v7  ;;  %v43_v18 = vpack.c.bf16 %v31_v15, %v30_v14  ;;  %v44_v19 = vpack.c.bf16 %v33_v17, %v32_v16  ;;  %v34_v20 = vld [vmem:[%s612_s0 + $0x50] sm:$0xff]  ;;  %v35_v21 = vld [vmem:[%s612_s0 + $0x58] sm:$0xff]  ;;  %v36_v22 = vld [vmem:[%s612_s0 + $0x60] sm:$0xff]  ;;  %451 = vset.pattern.permute.xlu0 %v483_v32  ;;  %s456_s11 = scalar_lea.vmem %s314_s10, 16  ;;  %s460_s12 = scalar_lea.vmem %s314_s10, 32 }
   0xf   :  { %v37_v23 = vld [vmem:[%s612_s0 + $0x68] sm:$0xff]  ;;  %v45_v24 = vpack.c.bf16 %v35_v21, %v34_v20  ;;  %v38_v26 = vld [vmem:[%s612_s0 + $0x70] sm:$0xff]  ;;  %v39_v27 = vld [vmem:[%s612_s0 + $0x78] sm:$0xff]  ;;  %p457_p0 = scmp.ne.s32.totalorder %s314_s10, %s456_s11  ;;  %p461_p1 = scmp.lt.s32.totalorder %s314_s10, %s314_s10 }
  0x10   :  { %v46_v25 = vpack.c.bf16 %v37_v23, %v36_v22  ;;  %v47_v28 = vpack.c.bf16 %v39_v27, %v38_v26  ;;  %v226_v31 = vld [vmem:[#allocation2] sm:$0x1]  ;;  %v232_v27 = vlaneseq  ;;  %p462_p2 = scmp.lt.s32.totalorder %s460_s12, %s456_s11 }
  0x11   :  { %370 = vmatpush3.bf16.msra.mxu0 %v455_v7  ;;  %229 = vperm.xlu0 %451, %v226_v31   ;;  %v321_v33 = vld [vmem:[%s614_s2] ss:$0 sm:$0xff] }
  0x12   :  { %v225_v26 = vld [vmem:[%s615_s3] sm:$0x1]  ;;  %p463_p3 = por %p462_p2, %p461_p1 }
  0x14   :  { %372 = vmatmul.mubr.msk.bf16.vlgmr.msra.gmra.mrb[0].mxu0 %vm87_vm0, %v41_v12  ;;  %p464_p4 = pnand %p463_p3, %p457_p0 }
  0x15   :  { %375 = vmatprep.mubr.msk.bf16.mxu0 %vm87_vm0, %v42_v13 }
  0x1c   :  { %376 = vmatmul.mubr.msk.bf16.gmra.mrb[4].mxu0 %vm87_vm0, %v43_v18 }
  0x1d   :  { %379 = vmatprep.mubr.msk.bf16.mxu0 %vm87_vm0, %v44_v19 }
  0x24   :  { %380 = vmatmul.mubr.msk.bf16.gmra.mrb[8].mxu0 %vm87_vm0, %v45_v24 }
  0x25   :  { %383 = vmatprep.mubr.msk.bf16.mxu0 %vm87_vm0, %v46_v25 }
  0x2c   :  { %384 = vmatmul.mubr.msk.bf16.gmra.mrb[12].mxu0 %vm87_vm0, %v47_v28  ;;  %v233_v28 = vshrl.u32 %v232_v27, 7 }
  0x2e   :  { %v234_v30 = vsub.s32 0, %v233_v28 }
  0x90   :  { %v230_v31 = vpop.permute.xlu0 %229 }
  0x91   :  { %v235_v32 = vrot.slane %v230_v31, %v234_v30 }
  0xe7   :  { %v373_v34 = vpop.f32.mrb[0].mxu0 }
  0xe8   :  { %v155_v35 = vadd.f32 %v373_v34, %v321_v33  ;;  %v146_v36 = vpop.f32.mrb[1].mxu0 }
  0xe9   :  { %v147_v37 = vadd.f32 %v321_v33, %v146_v36  ;;  %v374_v38 = vpop.f32.mrb[2].mxu0 }
  0xea   :  { %v158_v39 = vadd.f32 %v374_v38, %v321_v33  ;;  %v149_v40 = vpop.f32.mrb[3].mxu0  ;;  %v211_v42 = vmax.f32 %v155_v35, 0.0 }
  0xeb   :  { %v150_v41 = vadd.f32 %v321_v33, %v149_v40  ;;  %v209_v44 = vmax.f32 %v147_v37, 0.0 }
  0xec   :  { %v212_v43 = vmax.f32 %v158_v39, 0.0 }
  0xed   :  { %v210_v45 = vmax.f32 %v150_v41, 0.0 }
  0xee   :  { %v426_v46 = vpack.c.bf16 %v212_v43, %v211_v42 }
  0xef   :  { %v423_v47 = vpack.c.bf16 %v210_v45, %v209_v44  ;;  %v377_v48 = vpop.f32.mrb[4].mxu0 }
  0xf0   :  { %v171_v49 = vadd.f32 %v377_v48, %v321_v33  ;;  %v162_v50 = vpop.f32.mrb[5].mxu0 }
  0xf1   :  { %424 = vmatpush3.bf16.xpose.msra.mxu1 %v423_v47  ;;  %v163_v51 = vadd.f32 %v321_v33, %v162_v50  ;;  %v378_v52 = vpop.f32.mrb[6].mxu0 }
  0xf2   :  { %v215_v53 = vmax.f32 %v171_v49, 0.0  ;;  %v174_v54 = vadd.f32 %v378_v52, %v321_v33  ;;  %v165_v55 = vpop.f32.mrb[7].mxu0  ;;  %425 = vmatprep.subr.bf16.mxu1 %v480_v29 }
  0xf3   :  { %v213_v56 = vmax.f32 %v163_v51, 0.0  ;;  %v166_v57 = vadd.f32 %v321_v33, %v165_v55 }
  0xf4   :  { %v216_v58 = vmax.f32 %v174_v54, 0.0 }
  0xf5   :  { %v214_v59 = vmax.f32 %v166_v57, 0.0 }
  0xf6   :  { %v432_v60 = vpack.c.bf16 %v216_v58, %v215_v53 }
  0xf7   :  { %v429_v61 = vpack.c.bf16 %v214_v59, %v213_v56  ;;  %v381_v62 = vpop.f32.mrb[8].mxu0 }
  0xf8   :  { %v187_v63 = vadd.f32 %v381_v62, %v321_v33  ;;  %v178_v0 = vpop.f32.mrb[9].mxu0 }
  0xf9   :  { %427 = vmatpush3.bf16.xpose.msra.mxu1 %v426_v46  ;;  %v179_v1 = vadd.f32 %v321_v33, %v178_v0  ;;  %v382_v2 = vpop.f32.mrb[10].mxu0 }
  0xfa   :  { %428 = vmatprep.subr.bf16.mxu1 %v480_v29  ;;  %v219_v3 = vmax.f32 %v187_v63, 0.0  ;;  %v190_v4 = vadd.f32 %v382_v2, %v321_v33  ;;  %v181_v5 = vpop.f32.mrb[11].mxu0 }
  0xfb   :  { %v217_v6 = vmax.f32 %v179_v1, 0.0  ;;  %v182_v7 = vadd.f32 %v321_v33, %v181_v5 }
  0xfc   :  { %v220_v8 = vmax.f32 %v190_v4, 0.0 }
  0xfd   :  { %v218_v9 = vmax.f32 %v182_v7, 0.0 }
  0xfe   :  { %v438_v10 = vpack.c.bf16 %v220_v8, %v219_v3 }
  0xff   :  { %v435_v11 = vpack.c.bf16 %v218_v9, %v217_v6  ;;  %v385_v12 = vpop.f32.mrb[12].mxu0 }
 0x100   :  { %v203_v13 = vadd.f32 %v385_v12, %v321_v33  ;;  %v194_v14 = vpop.f32.mrb[13].mxu0 }
 0x101   :  { %430 = vmatpush3.bf16.xpose.msra.mxu1 %v429_v61  ;;  %v195_v15 = vadd.f32 %v321_v33, %v194_v14  ;;  %v386_v16 = vpop.f32.mrb[14].mxu0 }
 0x102   :  { %431 = vmatprep.subr.bf16.mxu1 %v480_v29  ;;  %v223_v17 = vmax.f32 %v203_v13, 0.0  ;;  %v206_v18 = vadd.f32 %v386_v16, %v321_v33  ;;  %v197_v19 = vpop.f32.mrb[15].mxu0 }
 0x103   :  { %v221_v20 = vmax.f32 %v195_v15, 0.0  ;;  %v198_v21 = vadd.f32 %v321_v33, %v197_v19 }
 0x104   :  { %v224_v22 = vmax.f32 %v206_v18, 0.0 }
 0x105   :  { %v222_v23 = vmax.f32 %v198_v21, 0.0 }
 0x106   :  { %v444_v24 = vpack.c.bf16 %v224_v22, %v223_v17 }
 0x107   :  { %v441_v25 = vpack.c.bf16 %v222_v23, %v221_v20 }
 0x109   :  { %433 = vmatpush3.bf16.xpose.msra.mxu1 %v432_v60 }
 0x10a   :  { %434 = vmatprep.subr.bf16.mxu1 %v480_v29 }
 0x111   :  { %436 = vmatpush3.bf16.xpose.msra.mxu1 %v435_v11 }
 0x112   :  { %437 = vmatprep.subr.bf16.mxu1 %v480_v29 }
 0x119   :  { %439 = vmatpush3.bf16.xpose.msra.mxu1 %v438_v10 }
 0x11a   :  { %440 = vmatprep.subr.bf16.mxu1 %v480_v29 }
 0x121   :  { %442 = vmatpush3.bf16.xpose.msra.mxu1 %v441_v25 }
 0x122   :  { %443 = vmatprep.subr.bf16.mxu1 %v480_v29 }
 0x129   :  { %445 = vmatpush3.bf16.xpose.msra.mxu1 %v444_v24 }
 0x130   :  { %420 = vmatmul.mubr.f32.vlgmr.msra.gmra.mrb[0].mxu1 %v225_v26 }
 0x203   :  { %v302_v33 = vpop.f32.mrb[0].mxu1 }
 0x204   :  { %v303_v34 = vadd.f32 %v302_v33, %v235_v32  ;;  %v421_v35 = vpop.f32.mrb[1].mxu1 }
 0x206   :  { %306 = vst [vmem:[#allocation3] sm:$0x1] %v303_v34 }
 0x207   :  { %467 = shalt.err (!%p464_p4)
}
 0x208   :  { %s468_s1 = scalar_lea.hbm %s617_s5, 16 }
 0x209   :  { %p469_p5 = scmp.ne.s32.totalorder %s617_s5, %s468_s1  ;;  %p472_p6 = scmp.lt.u32.totalorder %s468_s1, %s617_s5 }
 0x20b   :  { %p474_p7 = pnand %p472_p6, %p469_p5 }
 0x20d   :  { %477 = shalt.err (!%p474_p7)
}
 0x20e   :  { %316 = dma.vmem_to_hbm [thread:$0]  %s314_s10, 16, %s617_s5, [#allocation4]  }
 0x20f   :  { %478 = dma.done.wait [#allocation4], 16  }
 0x210   :  { %479 = vsyncadd [#allocation4], 4294967280 }
 0x211   :  { %320 = vsyncpa [#allocation4], 1 }

</bundles_post_ra>
